<compile_context>
chip_gen: v7x
topology: tpu7x:2x2x1
jax: 0.10.0
libtpu: 0.0.40
codegen_flags: <defaults>
</compile_context>

<pallas_src>
import jax
import jax.numpy as jnp
from jax.experimental import pallas as pl
from jax.experimental.pallas import tpu as pltpu


def _make_channel_attention_kernel(S, s_tile, need_mask):
    inv_s = 1.0 / float(S)

    def kernel(x_ref, w1_ref, w2_ref, o_ref, sum_acc, max_acc):
        # x_ref  : (C, s_tile) spatial tile of one batch row (batch squeezed)
        # w1_ref : (Cr, C)  fc1 weight (as stored by the module, no transpose)
        # w2_ref : (C, Cr)  fc2 weight
        # o_ref  : (C, 1)   sigmoid(MLP(avg) + MLP(max)) for this batch row
        # sum_acc / max_acc : (C, 1) f32 running accumulators (VMEM scratch)
        s = pl.program_id(1)

        @pl.when(s == 0)
        def _init():
            sum_acc[...] = jnp.zeros_like(sum_acc)
            max_acc[...] = jnp.full_like(max_acc, -jnp.inf)

        x = x_ref[...].astype(jnp.float32)  # (C, s_tile), f32 accumulation

        if need_mask:
            # Last spatial tile may hang off the end of S: mask padded lanes.
            col = s * s_tile + jax.lax.broadcasted_iota(jnp.int32, x.shape, 1)
            valid = col < S
            x_sum = jnp.where(valid, x, 0.0)
            x_max = jnp.where(valid, x, -jnp.inf)
        else:
            x_sum = x
            x_max = x

        # Per-tile partial reduce over the lane (spatial) axis, then
        # elementwise accumulate across grid steps into tiny (C, 1) scratch.
        sum_acc[...] += jnp.sum(x_sum, axis=1, keepdims=True)
        max_acc[...] = jnp.maximum(max_acc[...],
                                   jnp.max(x_max, axis=1, keepdims=True))

        @pl.when(s == pl.num_programs(1) - 1)
        def _finalize():
            w1 = w1_ref[...]  # (Cr, C)
            w2 = w2_ref[...]  # (Cr->C): (C, Cr)

            def mlp(p):  # p: (C, 1) column
                h = jnp.dot(w1, p, preferred_element_type=jnp.float32)  # (Cr, 1)
                h = jnp.maximum(h, 0.0)
                return jnp.dot(w2, h, preferred_element_type=jnp.float32)  # (C, 1)

            avg = sum_acc[...] * inv_s          # divide by full S exactly once
            logits = mlp(avg) + mlp(max_acc[...])
            o_ref[...] = jax.nn.sigmoid(logits).astype(o_ref.dtype)

    return kernel


def _choose_s_tile(S, C, itemsize, target_bytes=4 * 1024 * 1024):
    """Pick a lane-aligned spatial tile so a double-buffered block fits VMEM."""
    cols = target_bytes // max(1, C * itemsize)
    cols = max(128, (cols // 128) * 128)
    return S if cols >= S else int(cols)


def channel_attention(x_nchw, w1, w2, *, s_tile=None):
    """CBAM ChannelAttention forward.

    x_nchw: (B, C, H, W) activations (any float dtype).
    w1:     (C//r, C)  fc1 weight (squeezed from (C//r, C, 1, 1)).
    w2:     (C, C//r)  fc2 weight (squeezed from (C, C//r, 1, 1)).
    Returns the sigmoid channel-attention map of shape (B, C, 1, 1), f32.
    """
    B, C, H, W = x_nchw.shape
    S = H * W
    Cr = w1.shape[0]

    # Free reshape: channels stay on sublanes, spatial goes on lanes.
    x = x_nchw.reshape(B, C, S)                 # original dtype, no copy
    w1 = jnp.asarray(w1, jnp.float32)           # tiny; keep matmuls in f32
    w2 = jnp.asarray(w2, jnp.float32)

    if s_tile is None:
        s_tile = _choose_s_tile(S, C, jnp.dtype(x.dtype).itemsize)
    s_tile = min(int(s_tile), S)
    if s_tile < S and s_tile % 128 != 0:
        raise ValueError("s_tile must be a multiple of 128 (lane axis) or cover all of S")

    num_s = pl.cdiv(S, s_tile)
    need_mask = (S % s_tile) != 0

    kernel = _make_channel_attention_kernel(S, s_tile, need_mask)

    out = pl.pallas_call(
        kernel,
        out_shape=jax.ShapeDtypeStruct((B, C, 1), jnp.float32),
        grid_spec=pltpu.PrefetchScalarGridSpec(
            num_scalar_prefetch=0,
            grid=(B, num_s),
            in_specs=[
                # Streamed x tile: (C, s_tile) per (batch, spatial-tile) step.
                pl.BlockSpec((None, C, s_tile), lambda b, s: (b, 0, s)),
                # Tiny weights: constant index_map -> stay resident in VMEM.
                pl.BlockSpec((Cr, C), lambda b, s: (0, 0)),
                pl.BlockSpec((C, Cr), lambda b, s: (0, 0)),
            ],
            out_specs=pl.BlockSpec((None, C, 1), lambda b, s: (b, 0, 0)),
            scratch_shapes=[
                pltpu.VMEM((C, 1), jnp.float32),  # running sum
                pltpu.VMEM((C, 1), jnp.float32),  # running max
            ],
        ),
        compiler_params=pltpu.CompilerParams(
            dimension_semantics=("parallel", "arbitrary"),
            vmem_limit_bytes=32 * 1024 * 1024,
        ),
    )(x, w1, w2)

    return out.reshape(B, C, 1, 1)


def _reference(x_nchw, w1, w2):
    # Pure-JAX reference mirroring the PyTorch forward.
    avg = jnp.mean(x_nchw, axis=(2, 3))  # (B, C)
    mx = jnp.max(x_nchw, axis=(2, 3))    # (B, C)

    def mlp(p):
        return jnp.maximum(p @ w1.T, 0.0) @ w2.T

    return jax.nn.sigmoid(mlp(avg) + mlp(mx)).reshape(*avg.shape, 1, 1)


if __name__ == "__main__":
    # Small shapes consistent with the module: in_planes >= ratio.
    B, C, ratio = 2, 64, 16
    Cr = C // ratio  # 4

    key = jax.random.PRNGKey(0)
    kx, k1, k2, kx2 = jax.random.split(key, 4)

    # Deterministic Kaiming-like init for the two 1x1 conv weights (no bias).
    w1 = jax.random.normal(k1, (Cr, C), dtype=jnp.float32) * (2.0 / C) ** 0.5
    w2 = jax.random.normal(k2, (C, Cr), dtype=jnp.float32) * (2.0 / Cr) ** 0.5

    # Case 1: H=W=16 (S=256); auto tile -> single spatial tile per batch row.
    x = jax.random.normal(kx, (B, C, 16, 16), dtype=jnp.float32)
    ref = _reference(x, w1, w2)
    out = jax.block_until_ready(channel_attention(x, w1, w2))
    assert out.shape == (B, C, 1, 1)
    assert jnp.allclose(out, ref, atol=1e-5, rtol=1e-5), "mismatch vs reference"

    # Case 2: forced s_tile=128 -> two streamed tiles (accumulation path).
    out_t = jax.block_until_ready(channel_attention(x, w1, w2, s_tile=128))
    assert jnp.allclose(out_t, ref, atol=1e-5, rtol=1e-5), "tiled mismatch"

    # Case 3: ragged spatial tail (H=W=12 -> S=144, tile=128 -> masked tail).
    x2 = jax.random.normal(kx2, (B, C, 12, 12), dtype=jnp.float32)
    ref2 = _reference(x2, w1, w2)
    out2 = jax.block_until_ready(channel_attention(x2, w1, w2, s_tile=128))
    assert jnp.allclose(out2, ref2, atol=1e-5, rtol=1e-5), "ragged mismatch"

    print("KERNEL_OK")
</pallas_src>

<mosaic_0001>
module attributes {stable_mosaic.version = 11 : i64} {
  func.func @kernel(%arg0: i32, %arg1: i32, %arg2: memref<1x64x256xf32, #tpu.memory_space<vmem>>, %arg3: memref<4x64xf32, #tpu.memory_space<vmem>>, %arg4: memref<64x4xf32, #tpu.memory_space<vmem>>, %arg5: memref<1x64x1xf32, #tpu.memory_space<vmem>>, %arg6: memref<64x1xf32, #tpu.memory_space<vmem>>, %arg7: memref<64x1xf32, #tpu.memory_space<vmem>>) attributes {dimension_semantics = [#tpu.dimension_semantics<parallel>, #tpu.dimension_semantics<arbitrary>], iteration_bounds = array<i64: 2, 1>, scalar_prefetch = 0 : i64, scratch_operands = 2 : i64, tpu.core_type = #tpu.core_type<tc>, window_params = [{transform_indices = @transform_0, window_bounds = array<i64: 1, 64, 256>}, {pipeline_mode = #tpu.pipeline_mode<synchronous>, transform_indices = @transform_1, window_bounds = array<i64: 4, 64>}, {pipeline_mode = #tpu.pipeline_mode<synchronous>, transform_indices = @transform_2, window_bounds = array<i64: 64, 4>}, {transform_indices = @transform_3, window_bounds = array<i64: 1, 64, 1>}]} {
    %c0_i32 = arith.constant 0 : i32
    %0 = arith.cmpi eq, %arg1, %c0_i32 : i32
    %1 = arith.extui %0 : i1 to i32
    %c0_i32_0 = arith.constant 0 : i32
    %2 = arith.cmpi ne, %1, %c0_i32_0 : i32
    scf.if %2 {
      %cst_14 = arith.constant 0.000000e+00 : f32
      %18 = vector.broadcast %cst_14 : f32 to vector<64x1xf32>
      %c0_15 = arith.constant 0 : index
      %c0_16 = arith.constant 0 : index
      %19 = vector.load %arg6[%c0_15, %c0_16] : memref<64x1xf32, #tpu.memory_space<vmem>>, vector<64x1xf32>
      tpu.vector_store %arg6[%c0_15, %c0_16], %18 {strides = array<i32>} : memref<64x1xf32, #tpu.memory_space<vmem>>, vector<64x1xf32>,
      %cst_17 = arith.constant 0xFF800000 : f32
      %20 = vector.broadcast %cst_17 : f32 to vector<64x1xf32>
      %c0_18 = arith.constant 0 : index
      %c0_19 = arith.constant 0 : index
      %21 = vector.load %arg7[%c0_18, %c0_19] : memref<64x1xf32, #tpu.memory_space<vmem>>, vector<64x1xf32>
      tpu.vector_store %arg7[%c0_18, %c0_19], %20 {strides = array<i32>} : memref<64x1xf32, #tpu.memory_space<vmem>>, vector<64x1xf32>,
    } else {
    }
    %c0 = arith.constant 0 : index
    %c0_1 = arith.constant 0 : index
    %c0_2 = arith.constant 0 : index
    %3 = vector.load %arg2[%c0, %c0_1, %c0_2] : memref<1x64x256xf32, #tpu.memory_space<vmem>>, vector<1x64x256xf32>
    %4 = vector.shape_cast %3 : vector<1x64x256xf32> to vector<64x256xf32>
    %c0_3 = arith.constant 0 : index
    %c0_4 = arith.constant 0 : index
    %5 = vector.load %arg6[%c0_3, %c0_4] : memref<64x1xf32, #tpu.memory_space<vmem>>, vector<64x1xf32>
    %cst = arith.constant dense<0.000000e+00> : vector<64xf32>
    %6 = vector.multi_reduction <add>, %4, %cst [1] : vector<64x256xf32> to vector<64xf32>
    %7 = vector.shape_cast %6 : vector<64xf32> to vector<64x1xf32>
    %8 = arith.addf %5, %7 : vector<64x1xf32>
    %c0_5 = arith.constant 0 : index
    %c0_6 = arith.constant 0 : index
    %9 = vector.load %arg6[%c0_5, %c0_6] : memref<64x1xf32, #tpu.memory_space<vmem>>, vector<64x1xf32>
    tpu.vector_store %arg6[%c0_5, %c0_6], %8 {strides = array<i32>} : memref<64x1xf32, #tpu.memory_space<vmem>>, vector<64x1xf32>,
    %c0_7 = arith.constant 0 : index
    %c0_8 = arith.constant 0 : index
    %10 = vector.load %arg7[%c0_7, %c0_8] : memref<64x1xf32, #tpu.memory_space<vmem>>, vector<64x1xf32>
    %cst_9 = arith.constant dense<0xFF800000> : vector<64xf32>
    %11 = vector.multi_reduction <maximumf>, %4, %cst_9 [1] : vector<64x256xf32> to vector<64xf32>
    %12 = vector.shape_cast %11 : vector<64xf32> to vector<64x1xf32>
    %13 = arith.maximumf %10, %12 : vector<64x1xf32>
    %c0_10 = arith.constant 0 : index
    %c0_11 = arith.constant 0 : index
    %14 = vector.load %arg7[%c0_10, %c0_11] : memref<64x1xf32, #tpu.memory_space<vmem>>, vector<64x1xf32>
    tpu.vector_store %arg7[%c0_10, %c0_11], %13 {strides = array<i32>} : memref<64x1xf32, #tpu.memory_space<vmem>>, vector<64x1xf32>,
    %c0_i32_12 = arith.constant 0 : i32
    %15 = arith.cmpi eq, %arg1, %c0_i32_12 : i32
    %16 = arith.extui %15 : i1 to i32
    %c0_i32_13 = arith.constant 0 : i32
    %17 = arith.cmpi ne, %16, %c0_i32_13 : i32
    scf.if %17 {
      %c0_14 = arith.constant 0 : index
      %c0_15 = arith.constant 0 : index
      %18 = vector.load %arg3[%c0_14, %c0_15] : memref<4x64xf32, #tpu.memory_space<vmem>>, vector<4x64xf32>
      %c0_16 = arith.constant 0 : index
      %c0_17 = arith.constant 0 : index
      %19 = vector.load %arg4[%c0_16, %c0_17] : memref<64x4xf32, #tpu.memory_space<vmem>>, vector<64x4xf32>
      %c0_18 = arith.constant 0 : index
      %c0_19 = arith.constant 0 : index
      %20 = vector.load %arg6[%c0_18, %c0_19] : memref<64x1xf32, #tpu.memory_space<vmem>>, vector<64x1xf32>
      %cst_20 = arith.constant 3.906250e-03 : f32
      %21 = vector.broadcast %cst_20 : f32 to vector<64x1xf32>
      %22 = arith.mulf %20, %21 : vector<64x1xf32>
      %cst_21 = arith.constant dense<0.000000e+00> : vector<4x1xf32>
      %23 = tpu.matmul %18, %22, %cst_21 {dimension_numbers = #tpu.dot_dimension_numbers<[1], [0], [0], [1], [0, 0, 1, 1], [], []>} : vector<4x64xf32>, vector<64x1xf32>, vector<4x1xf32> -> vector<4x1xf32>
      %cst_22 = arith.constant 0.000000e+00 : f32
      %24 = vector.broadcast %cst_22 : f32 to vector<4x1xf32>
      %25 = arith.maximumf %23, %24 : vector<4x1xf32>
      %cst_23 = arith.constant dense<0.000000e+00> : vector<64x1xf32>
      %26 = tpu.matmul %19, %25, %cst_23 {dimension_numbers = #tpu.dot_dimension_numbers<[1], [0], [0], [1], [0, 0, 1, 1], [], []>} : vector<64x4xf32>, vector<4x1xf32>, vector<64x1xf32> -> vector<64x1xf32>
      %c0_24 = arith.constant 0 : index
      %c0_25 = arith.constant 0 : index
      %27 = vector.load %arg7[%c0_24, %c0_25] : memref<64x1xf32, #tpu.memory_space<vmem>>, vector<64x1xf32>
      %cst_26 = arith.constant dense<0.000000e+00> : vector<4x1xf32>
      %28 = tpu.matmul %18, %27, %cst_26 {dimension_numbers = #tpu.dot_dimension_numbers<[1], [0], [0], [1], [0, 0, 1, 1], [], []>} : vector<4x64xf32>, vector<64x1xf32>, vector<4x1xf32> -> vector<4x1xf32>
      %cst_27 = arith.constant 0.000000e+00 : f32
      %29 = vector.broadcast %cst_27 : f32 to vector<4x1xf32>
      %30 = arith.maximumf %28, %29 : vector<4x1xf32>
      %cst_28 = arith.constant dense<0.000000e+00> : vector<64x1xf32>
      %31 = tpu.matmul %19, %30, %cst_28 {dimension_numbers = #tpu.dot_dimension_numbers<[1], [0], [0], [1], [0, 0, 1, 1], [], []>} : vector<64x4xf32>, vector<4x1xf32>, vector<64x1xf32> -> vector<64x1xf32>
      %32 = arith.addf %26, %31 : vector<64x1xf32>
      %33 = arith.negf %32 : vector<64x1xf32>
      %34 = math.exp %33 : vector<64x1xf32>
      %cst_29 = arith.constant 1.000000e+00 : f32
      %35 = vector.broadcast %cst_29 : f32 to vector<64x1xf32>
      %36 = arith.addf %35, %34 : vector<64x1xf32>
      %37 = arith.divf %35, %36 : vector<64x1xf32>
      %c0_30 = arith.constant 0 : index
      %c0_31 = arith.constant 0 : index
      %c0_32 = arith.constant 0 : index
      %38 = vector.load %arg5[%c0_30, %c0_31, %c0_32] : memref<1x64x1xf32, #tpu.memory_space<vmem>>, vector<1x64x1xf32>
      %39 = vector.shape_cast %38 : vector<1x64x1xf32> to vector<64x1xf32>
      %40 = vector.shape_cast %37 : vector<64x1xf32> to vector<1x64x1xf32>
      tpu.vector_store %arg5[%c0_30, %c0_31, %c0_32], %40 {strides = array<i32>} : memref<1x64x1xf32, #tpu.memory_space<vmem>>, vector<1x64x1xf32>,
    } else {
    }
    return
  }
  func.func @transform_0(%arg0: i32, %arg1: i32) -> (i32, i32, i32) {
    %c0_i32 = arith.constant 0 : i32
    %c0_i32_0 = arith.constant 0 : i32
    return %arg0, %c0_i32, %arg1 : i32, i32, i32
  }
  func.func @transform_1(%arg0: i32, %arg1: i32) -> (i32, i32) {
    %c0_i32 = arith.constant 0 : i32
    %c0_i32_0 = arith.constant 0 : i32
    %c0_i32_1 = arith.constant 0 : i32
    return %c0_i32, %c0_i32_0 : i32, i32
  }
  func.func @transform_2(%arg0: i32, %arg1: i32) -> (i32, i32) {
    %c0_i32 = arith.constant 0 : i32
    %c0_i32_0 = arith.constant 0 : i32
    %c0_i32_1 = arith.constant 0 : i32
    return %c0_i32, %c0_i32_0 : i32, i32
  }
  func.func @transform_3(%arg0: i32, %arg1: i32) -> (i32, i32, i32) {
    %c0_i32 = arith.constant 0 : i32
    %c0_i32_0 = arith.constant 0 : i32
    %c0_i32_1 = arith.constant 0 : i32
    return %arg0, %c0_i32, %c0_i32_0 : i32, i32, i32
  }
}

</mosaic_0001>

<bundles_post_ra>
// kernel: tpu_custom_call.1
= control target key start
LH: loop header
LB: loop body
LE: loop exit
PB: predicated region body
PF: predicated region fallthrough
CT: control target
= control target key end

     0   :  { %8 = vsyncpa [#allocation5], 0  ;;  %s1526_s0 = inlined_call_operand.hbm [shape: f32[2,64,256], index: 0, kind: input, shape index: {}]   ;;  %s1527_s1 = inlined_call_operand.vmem [shape: f32[4,64], index: 1, kind: input, shape index: {}]   ;;  %s1528_s2 = inlined_call_operand.vmem [shape: f32[64,4], index: 2, kind: input, shape index: {}]   ;;  %s1529_s3 = inlined_call_operand.vmem [shape: f32[2,64,1], index: 3, kind: output, shape index: {}]  }
   0x1   :  { %10 = vsyncpa [#allocation5 + $0x1], 0  ;;  %s1279_s12 = smov 0   ;;  %s1281_s13 = smov 0  }
   0x2   :  { %s1283_s14 = smov 0   ;;  %s1285_s15 = smov 0  }
   0x3   :  { %s1287_s16 = smov 0   ;;  %s1289_s17 = smov 0  }
   0x4 LB: > { %s900_s18 = sadd.s32 4294967295, %s1250_s17   ;;  %s28_s19 = sadd.s32 1, %s1246_s16  ;;  %s1250_s17 = sphi %s1289_s17, %s16_s17   ;;  %s1246_s16 = sphi %s1287_s16, %s1537_s16   ;;  %s1242_s15 = sphi %s1285_s15, %s1536_s15   ;;  %s1238_s14 = sphi %s1283_s14, %s1535_s14   ;;  %s1234_s13 = sphi %s1281_s13, %s1534_s13   ;;  %s1230_s12 = sphi %s1279_s12, %s1533_s12  }
   0x5   : > { %p30_p0 = scmp.ge.s32.totalorder %s28_s19, 2  ;;  %s37_s20 = sadd.s32 1, %s1238_s14 }
   0x6   : > { %p44_p1 = scmp.ne.s32.totalorder %s1238_s14, %s1234_s13  ;;  %p45_p2 = scmp.eq.s32.totalorder %s1250_s17, 0 }
   0x7   : > { %s1539_s19 = smov (%p30_p0, %s28_s19), 0  ;;  %p50_p4 = scmp.ne.s32.totalorder %s1234_s13, %s1230_s12 }
   0x8   : > { %p1315_p3 = por %p45_p2, %p44_p1  ;;  %s32_s22 = ssub.s32 %s1246_s16, %s1539_s19 }
   0x9   : > { %p51_p5 = scmp.eq.s32.totalorder %s900_s18, 0  ;;  %p35_p6 = scmp.eq.s32.totalorder %s32_s22, 0 }
   0xa   : > { %p1083_p8 = scmp.lt.s32.totalorder %s1250_s17, 2  ;;  %s148_s25 = sand.u32 1, %s1238_s14  }
   0xb   : > { %p1322_p7 = por %p51_p5, %p50_p4  ;;  %s941_s26 = sshll.u32 %s1246_s16, 11 }
   0xc   : > { %s1328_s24 = scalar_select %p35_p6, %s1238_s14, %s37_s20  }
   0xd   : > { %s904_s27 = sshll.u32 %s148_s25, 7  ;;  %s1335_s30 = scalar_lea.hbm %s1526_s0, %s941_s26 }
   0xe   : > { %s152_s4 = scalar_lea.vmem [#allocation4], %s904_s27  ;;  %p1339_p9 = pnand %p1083_p8, %p1315_p3 }
   0xf   : > { %s161_s5 = sshll.u32 %s152_s4, 4  ;;  %s1345_s7 = scalar_lea.sflag [#allocation5], %s148_s25  ;;  %s1343_s5 = int_to_ptr.vmem [resolvable:$true] %s161_s5 }
  0x10   : > { %s1170_s8 = scalar_lea.hbm %s1335_s30, 2048  ;;  %p1172_p11 = pneg %p1339_p9 }
  0x11   : > { %p1171_p10 = scmp.ne.s32.totalorder %s1335_s30, %s1170_s8  ;;  %s1175_s11 = scalar_lea.hbm %s1526_s0, 4096 }
  0x12   : > { %p1176_p0 = scmp.lt.u32.totalorder %s1335_s30, %s1526_s0  ;;  %p1177_p1 = scmp.lt.u32.totalorder %s1175_s11, %s1170_s8 }
  0x13   : > { %p1173_p12 = pnand %p1172_p11, %p1171_p10  ;;  %p1179_p3 = scmp.lt.u32.totalorder %s1170_s8, %s1335_s30 }
  0x14   : > { %p1178_p2 = por %p1177_p1, %p1176_p0 }
  0x15   : > { %p1174_p13 = pneg %p1173_p12 }
  0x16   : > { %p1180_p4 = por %p1179_p3, %p1178_p2 }
  0x18   : > { %p1181_p5 = pnand %p1180_p4, %p1174_p13 }
  0x1a   : > { %1184 = shalt.err (!%p1181_p5)
}
  0x1b   : > { %s1185_s20 = scalar_lea.vmem %s1343_s5, 2048  ;;  %s1252_s21 = smov [#allocation4]  }
  0x1c   : > { %p1186_p6 = scmp.ne.s32.totalorder %s1343_s5, %s1185_s20  ;;  %s1190_s22 = sshll.u32 %s1252_s21, 4  ;;  %s1191_s22 = int_to_ptr.vmem [resolvable:$false] %s1190_s22 }
  0x1d   : > { %s1192_s25 = scalar_lea.vmem %s1191_s22, 4096  ;;  %p1193_p12 = scmp.lt.s32.totalorder %s1343_s5, %s1191_s22 }
  0x1e   : > { %p1188_p8 = pnand %p1186_p6, %p1172_p11  ;;  %p1194_p0 = scmp.lt.s32.totalorder %s1192_s25, %s1185_s20 }
  0x20   : > { %p1189_p10 = pneg %p1188_p8  ;;  %p1195_p1 = por %p1194_p0, %p1193_p12 }
  0x22   : > { %p1196_p2 = pnand %p1195_p1, %p1189_p10 }
  0x24   : > { %1199 = shalt.err (!%p1196_p2)
}
  0x25   : > { %s1253_s26 = smov 256   ;;  %s1254_s27 = smov 16  }
  0x26   : > { %1082 = dma.hbm_to_vmem [thread:$0]  (!%p1339_p9), %s1335_s30, 2048, %s1343_s5, %s1345_s7, %s1253_s26, %s1253_s26, %s1254_s27  }
  0x27   : > { %p907_p11 = scmp.ge.s32.totalorder %s1250_s17, 1  ;;  %p169_p13 = scmp.lt.s32.totalorder %s1250_s17, 3 }
  0x29   : > { %p170_p3 = pnand %p907_p11, %p169_p13 }
  0x2a   : > { %s175_s28 = sand.u32 (!%p170_p3), 1, %s1234_s13  }
  0x2b   : > { %173 = sbr.rel (%p170_p3) target bundleno = 732 (0x2dc), region = 32  ;;  %s908_s29 = sshll.u32 (!%p170_p3), %s175_s28, 7 }
  0x2c   : > { %s176_s4 = scalar_lea.sflag (!%p170_p3), [#allocation5], %s175_s28  ;;  %s1376_s8 = scalar_lea.vmem (!%p170_p3), [#allocation4], %s908_s29 }
  0x32   : > { %1225 = dma.done.wait (%p1322_p7), %s176_s4, 2048  }
  0x33   : > { %1227 = vsyncadd (%p1322_p7), %s176_s4, 4294965248  ;;  %vm212_vm0 = vcmask 7168   ;;  %v1255_v0 = vmov 0.0   ;;  %v233_v1 = vld [vmem:[%s1376_s8 + $0x20] sm:$0xff]  ;;  %v234_v2 = vld [vmem:[%s1376_s8 + $0x28] sm:$0xff]  ;;  %v1256_v33 = vmov -inf  }
  0x34   : > { %215 = vst.msk [vmem:[#allocation2 + $0x10] sm:$0xff] %vm212_vm0, %v1255_v0  ;;  %213 = vst.msk [vmem:[#allocation2] sm:$0xff] %vm212_vm0, %v1255_v0  ;;  %v229_v3 = vld [vmem:[%s1376_s8] sm:$0xff]  ;;  %v259_v4 = vadd.f32 %v234_v2, %v233_v1  ;;  %v230_v5 = vld [vmem:[%s1376_s8 + $0x8] sm:$0xff]  ;;  %v308_v28 = vmax.f32 %v233_v1, %v234_v2  ;;  %v1257_v34 = vmov 0.0|0.0   ;;  %vm1258_vm1 = vmmov 0  }
  0x35   : > { %214 = vst.msk [vmem:[#allocation2 + $0x8] sm:$0xff] %vm212_vm0, %v1255_v0  ;;  %216 = vst.msk [vmem:[#allocation2 + $0x18] sm:$0xff] %vm212_vm0, %v1255_v0  ;;  %v235_v6 = vld [vmem:[%s1376_s8 + $0x30] sm:$0xff]  ;;  %v236_v7 = vld [vmem:[%s1376_s8 + $0x38] sm:$0xff]  ;;  %v253_v8 = vadd.f32 %v230_v5, %v229_v3  ;;  %v302_v26 = vmax.f32 %v229_v3, %v230_v5  ;;  %1045 = vmatprep.subr.bf16.mxu1 %v1257_v34  ;;  %995 = vmatprep.mubr.msk.f32.mxu1 %vm1258_vm1, %v1255_v0  ;;  %vm370_vm2 = vcmask 523264   ;;  %vm524_vm3 = vcmask 31744  }
  0x36   : > { %217 = vst.msk [vmem:[#allocation2 + $0x20] sm:$0xff] %vm212_vm0, %v1255_v0  ;;  %218 = vst.msk [vmem:[#allocation2 + $0x28] sm:$0xff] %vm212_vm0, %v1255_v0  ;;  %v231_v9 = vld [vmem:[%s1376_s8 + $0x10] sm:$0xff]  ;;  %v232_v10 = vld [vmem:[%s1376_s8 + $0x18] sm:$0xff]  ;;  %260 = vadd.xlane.f32.xlu1 %v259_v4  ;;  %v262_v11 = vadd.f32 %v236_v7, %v235_v6  ;;  %v311_v27 = vmax.f32 %v235_v6, %v236_v7  ;;  %vm549_vm4 = vcmask 1043456   ;;  %p203_p7 = scmp.lt.s32.totalorder %s1242_s15, 1 }
  0x37   : > { %219 = vst.msk [vmem:[#allocation2 + $0x30] sm:$0xff] %vm212_vm0, %v1255_v0  ;;  %220 = vst.msk [vmem:[#allocation2 + $0x38] sm:$0xff] %vm212_vm0, %v1255_v0  ;;  %254 = vadd.xlane.f32.xlu0 %v253_v8  ;;  %v256_v12 = vadd.f32 %v232_v10, %v231_v9  ;;  %v239_v13 = vld [vmem:[%s1376_s8 + $0x50] sm:$0xff]  ;;  %v240_v14 = vld [vmem:[%s1376_s8 + $0x58] sm:$0xff]  ;;  %v305_v25 = vmax.f32 %v231_v9, %v232_v10 }
  0x38   : > { %v237_v15 = vld [vmem:[%s1376_s8 + $0x40] sm:$0xff]  ;;  %v238_v16 = vld [vmem:[%s1376_s8 + $0x48] sm:$0xff]  ;;  %v268_v17 = vadd.f32 %v240_v14, %v239_v13  ;;  %v243_v19 = vld [vmem:[%s1376_s8 + $0x70] sm:$0xff]  ;;  %v317_v29 = vmax.f32 %v239_v13, %v240_v14  ;;  %222 = vst.msk [vmem:[#allocation3 + $0x8] sm:$0xff] %vm212_vm0, %v1256_v33  ;;  %s1541_s15 = smov (!%p203_p7, %s1242_s15), 1 }
  0x39   : > { %v265_v18 = vadd.f32 %v238_v16, %v237_v15  ;;  %v244_v20 = vld [vmem:[%s1376_s8 + $0x78] sm:$0xff]  ;;  %v241_v21 = vld [vmem:[%s1376_s8 + $0x60] sm:$0xff]  ;;  %v242_v22 = vld [vmem:[%s1376_s8 + $0x68] sm:$0xff]  ;;  %v314_v30 = vmax.f32 %v237_v15, %v238_v16  ;;  %221 = vst.msk [vmem:[#allocation3] sm:$0xff] %vm212_vm0, %v1256_v33  ;;  %s942_s4 = sshll.u32 %s1541_s15, 6 }
  0x3a   : > { %263 = vadd.xlane.f32.xlu1 %v262_v11  ;;  %v274_v23 = vadd.f32 %v244_v20, %v243_v19  ;;  %v271_v24 = vadd.f32 %v242_v22, %v241_v21  ;;  %v323_v31 = vmax.f32 %v243_v19, %v244_v20  ;;  %v320_v32 = vmax.f32 %v241_v21, %v242_v22  ;;  %s207_s30 = scalar_lea.vmem %s1529_s3, %s942_s4 }
  0x3b   : > { %257 = vadd.xlane.f32.xlu0 %v256_v12  ;;  %223 = vst.msk [vmem:[#allocation3 + $0x10] sm:$0xff] %vm212_vm0, %v1256_v33  ;;  %224 = vst.msk [vmem:[#allocation3 + $0x18] sm:$0xff] %vm212_vm0, %v1256_v33  ;;  %v247_v35 = vld [vmem:[#allocation2 + $0x10] sm:$0xff]  ;;  %v245_v36 = vld [vmem:[#allocation2] sm:$0xff] }
  0x3c   : > { %225 = vst.msk [vmem:[#allocation3 + $0x20] sm:$0xff] %vm212_vm0, %v1256_v33  ;;  %226 = vst.msk [vmem:[#allocation3 + $0x28] sm:$0xff] %vm212_vm0, %v1256_v33  ;;  %v248_v41 = vld [vmem:[#allocation2 + $0x18] sm:$0xff]  ;;  %v246_v42 = vld [vmem:[#allocation2 + $0x8] sm:$0xff] }
  0x3d   : > { %227 = vst.msk [vmem:[#allocation3 + $0x30] sm:$0xff] %vm212_vm0, %v1256_v33  ;;  %228 = vst.msk [vmem:[#allocation3 + $0x38] sm:$0xff] %vm212_vm0, %v1256_v33  ;;  %v250_v47 = vld [vmem:[#allocation2 + $0x28] sm:$0xff]  ;;  %v249_v48 = vld [vmem:[#allocation2 + $0x20] sm:$0xff] }
  0x3e   : > { %269 = vadd.xlane.f32.xlu1 %v268_v17  ;;  %v252_v53 = vld [vmem:[#allocation2 + $0x38] sm:$0xff]  ;;  %v251_v54 = vld [vmem:[#allocation2 + $0x30] sm:$0xff] }
  0x3f   : > { %266 = vadd.xlane.f32.xlu0 %v265_v18  ;;  %v295_v60 = vld [vmem:[#allocation3 + $0x8] sm:$0xff] }
  0x40   : > { %v294_v61 = vld [vmem:[#allocation3] sm:$0xff] }
  0x42   : > { %275 = vadd.xlane.f32.xlu1 %v274_v23  ;;  %v297_v11 = vld [vmem:[#allocation3 + $0x18] sm:$0xff]  ;;  %v296_v13 = vld [vmem:[#allocation3 + $0x10] sm:$0xff] }
  0x43   : > { %272 = vadd.xlane.f32.xlu0 %v271_v24  ;;  %v299_v22 = vld [vmem:[#allocation3 + $0x28] sm:$0xff]  ;;  %v298_v24 = vld [vmem:[#allocation3 + $0x20] sm:$0xff] }
  0x44   : > { %v301_v33 = vld [vmem:[#allocation3 + $0x38] sm:$0xff] }
  0x46   : > { %306 = vmax.xlane.f32.xlu1 %v305_v25 }
  0x47   : > { %303 = vmax.xlane.f32.xlu0 %v302_v26 }
  0x4a   : > { %312 = vmax.xlane.f32.xlu1 %v311_v27 }
  0x4b   : > { %309 = vmax.xlane.f32.xlu0 %v308_v28 }
  0x4e   : > { %318 = vmax.xlane.f32.xlu1 %v317_v29 }
  0x4f   : > { %315 = vmax.xlane.f32.xlu0 %v314_v30 }
  0x52   : > { %324 = vmax.xlane.f32.xlu1 %v323_v31 }
  0x53   : > { %321 = vmax.xlane.f32.xlu0 %v320_v32 }
  0xc3   : > { %v261_v37 = vpop.xlane.xlu1 %260 }
  0xc4   : > { %v279_v38 = vadd.f32 %v261_v37, %v247_v35  ;;  %v255_v39 = vpop.xlane.xlu0 %254  ;;  %v300_v35 = vld [vmem:[#allocation3 + $0x30] sm:$0xff] }
  0xc5   : > { %v277_v40 = vadd.f32 %v255_v39, %v245_v36 }
  0xc6   : > { %288 = vst.msk [vmem:[#allocation2 + $0x10] sm:$0xff] %vm212_vm0, %v279_v38 }
  0xc7   : > { %286 = vst.msk [vmem:[#allocation2] sm:$0xff] %vm212_vm0, %v277_v40  ;;  %v264_v43 = vpop.xlane.xlu1 %263 }
  0xc8   : > { %v280_v44 = vadd.f32 %v264_v43, %v248_v41  ;;  %v258_v45 = vpop.xlane.xlu0 %257  ;;  %v345_v43 = vld [vmem:[%s1527_s1] sm:$0xf] }
  0xc9   : > { %v278_v46 = vadd.f32 %v258_v45, %v246_v42 }
  0xca   : > { %289 = vst.msk [vmem:[#allocation2 + $0x18] sm:$0xff] %vm212_vm0, %v280_v44 }
  0xcb   : > { %287 = vst.msk [vmem:[#allocation2 + $0x8] sm:$0xff] %vm212_vm0, %v278_v46  ;;  %v270_v49 = vpop.xlane.xlu1 %269 }
  0xcc   : > { %v282_v50 = vadd.f32 %v270_v49, %v250_v47  ;;  %v267_v51 = vpop.xlane.xlu0 %266 }
  0xcd   : > { %v281_v52 = vadd.f32 %v267_v51, %v249_v48  ;;  %v356_v63 = vld [vmem:[#allocation2 + $0x10] sm:$0xff] }
  0xce   : > { %291 = vst.msk [vmem:[#allocation2 + $0x28] sm:$0xff] %vm212_vm0, %v282_v50  ;;  %v354_v58 = vld [vmem:[#allocation2] sm:$0xff]  ;;  %v364_v9 = vmul.f32 0.00390625, %v356_v63  ;;  %v351_v63 = vld [vmem:[%s1528_s2 + $0x28] sm:$0xff] }
  0xcf   : > { %290 = vst.msk [vmem:[#allocation2 + $0x20] sm:$0xff] %vm212_vm0, %v281_v52  ;;  %v276_v55 = vpop.xlane.xlu1 %275  ;;  %v362_v2 = vmul.f32 0.00390625, %v354_v58 }
  0xd0   : > { %v284_v56 = vadd.f32 %v276_v55, %v252_v53  ;;  %v273_v57 = vpop.xlane.xlu0 %272 }
  0xd1   : > { %v283_v59 = vadd.f32 %v273_v57, %v251_v54  ;;  %v357_v1 = vld [vmem:[#allocation2 + $0x18] sm:$0xff] }
  0xd2   : > { %293 = vst.msk [vmem:[#allocation2 + $0x38] sm:$0xff] %vm212_vm0, %v284_v56  ;;  %v355_v62 = vld [vmem:[#allocation2 + $0x8] sm:$0xff]  ;;  %v365_v10 = vmul.f32 0.00390625, %v357_v1  ;;  %v352_v1 = vld [vmem:[%s1528_s2 + $0x30] sm:$0xff] }
  0xd3   : > { %292 = vst.msk [vmem:[#allocation2 + $0x30] sm:$0xff] %vm212_vm0, %v283_v59  ;;  %v363_v3 = vmul.f32 0.00390625, %v355_v62  ;;  %v307_v4 = vpop.xlane.xlu1 %306  ;;  %v350_v62 = vld [vmem:[%s1528_s2 + $0x20] sm:$0xff] }
  0xd4   : > { %v327_v5 = vmax.f32 %v295_v60, %v307_v4  ;;  %v304_v6 = vpop.xlane.xlu0 %303  ;;  %v1049_v20 = vpack.c.bf16 %v365_v10, %v364_v9  ;;  %v348_v60 = vld [vmem:[%s1528_s2 + $0x10] sm:$0xff] }
  0xd5   : > { %v1046_v7 = vpack.c.bf16 %v363_v3, %v362_v2  ;;  %v326_v8 = vmax.f32 %v294_v61, %v304_v6  ;;  %v359_v12 = vld [vmem:[#allocation2 + $0x28] sm:$0xff]  ;;  %v349_v61 = vld [vmem:[%s1528_s2 + $0x18] sm:$0xff] }
  0xd6   : > { %335 = vst.msk [vmem:[#allocation3 + $0x8] sm:$0xff] %vm212_vm0, %v327_v5  ;;  %v358_v14 = vld [vmem:[#allocation2 + $0x20] sm:$0xff]  ;;  %v367_v17 = vmul.f32 0.00390625, %v359_v12  ;;  %v353_v2 = vld [vmem:[%s1528_s2 + $0x38] sm:$0xff] }
  0xd7   : > { %1047 = vmatpush3.bf16.msra.mxu1 %v1046_v7  ;;  %334 = vst.msk [vmem:[#allocation3] sm:$0xff] %vm212_vm0, %v326_v8  ;;  %v313_v15 = vpop.xlane.xlu1 %312  ;;  %v366_v16 = vmul.f32 0.00390625, %v358_v14 }
  0xd8   : > { %1048 = vmatprep.subr.bf16.mxu1 %v1257_v34  ;;  %v329_v18 = vmax.f32 %v297_v11, %v313_v15  ;;  %v310_v19 = vpop.xlane.xlu0 %309 }
  0xd9   : > { %v328_v21 = vmax.f32 %v296_v13, %v310_v19  ;;  %v361_v23 = vld [vmem:[#allocation2 + $0x38] sm:$0xff]  ;;  %v1052_v26 = vpack.c.bf16 %v367_v17, %v366_v16 }
  0xda   : > { %337 = vst.msk [vmem:[#allocation3 + $0x18] sm:$0xff] %vm212_vm0, %v329_v18  ;;  %v360_v25 = vld [vmem:[#allocation2 + $0x30] sm:$0xff]  ;;  %v369_v29 = vmul.f32 0.00390625, %v361_v23 }
  0xdb   : > { %1050 = vmatpush3.bf16.msra.mxu1 %v1049_v20  ;;  %336 = vst.msk [vmem:[#allocation3 + $0x10] sm:$0xff] %vm212_vm0, %v328_v21  ;;  %v319_v27 = vpop.xlane.xlu1 %318  ;;  %v368_v28 = vmul.f32 0.00390625, %v360_v25 }
  0xdc   : > { %1051 = vmatprep.subr.bf16.mxu1 %v1257_v34  ;;  %v331_v30 = vmax.f32 %v299_v22, %v319_v27  ;;  %v316_v31 = vpop.xlane.xlu0 %315 }
  0xdd   : > { %v330_v32 = vmax.f32 %v298_v24, %v316_v31  ;;  %v1055_v36 = vpack.c.bf16 %v369_v29, %v368_v28  ;;  %v446_v41 = vld [vmem:[#allocation3 + $0x8] sm:$0xff] }
  0xde   : > { %339 = vst.msk [vmem:[#allocation3 + $0x28] sm:$0xff] %vm212_vm0, %v331_v30  ;;  %v445_v40 = vld [vmem:[#allocation3] sm:$0xff] }
  0xdf   : > { %1053 = vmatpush3.bf16.msra.mxu1 %v1052_v26  ;;  %338 = vst.msk [vmem:[#allocation3 + $0x20] sm:$0xff] %vm212_vm0, %v330_v32  ;;  %v325_v37 = vpop.xlane.xlu1 %324  ;;  %v1058_v44 = vpack.c.bf16 %v446_v41, %v445_v40 }
  0xe0   : > { %1054 = vmatprep.subr.bf16.mxu1 %v1257_v34  ;;  %v333_v38 = vmax.f32 %v301_v33, %v325_v37  ;;  %v322_v39 = vpop.xlane.xlu0 %321 }
  0xe1   : > { %v332_v42 = vmax.f32 %v300_v35, %v322_v39  ;;  %v448_v46 = vld [vmem:[#allocation3 + $0x18] sm:$0xff] }
  0xe2   : > { %341 = vst.msk [vmem:[#allocation3 + $0x38] sm:$0xff] %vm212_vm0, %v333_v38  ;;  %v447_v45 = vld [vmem:[#allocation3 + $0x10] sm:$0xff] }
  0xe3   : > { %1056 = vmatpush3.bf16.msra.mxu1 %v1055_v36  ;;  %340 = vst.msk [vmem:[#allocation3 + $0x30] sm:$0xff] %vm212_vm0, %v332_v42  ;;  %v1061_v47 = vpack.c.bf16 %v448_v46, %v447_v45 }
  0xe4   : > { %1057 = vmatprep.subr.bf16.mxu1 %v1257_v34 }
  0xe5   : > { %v450_v49 = vld [vmem:[#allocation3 + $0x28] sm:$0xff] }
  0xe6   : > { %996 = vmatmul.mubr.msk.f32.vlgmr.msra.gmra.mrb[0].mxu1 %vm370_vm2, %v345_v43  ;;  %v449_v48 = vld [vmem:[#allocation3 + $0x20] sm:$0xff] }
  0xe7   : > { %1059 = vmatpush3.bf16.msra.mxu1 %v1058_v44  ;;  %1014 = vmatprep.mubr.msk.f32.mxu1 %vm1258_vm1, %v1255_v0  ;;  %v1064_v50 = vpack.c.bf16 %v450_v49, %v449_v48  ;;  %v346_v0 = vld [vmem:[%s1528_s2] sm:$0xff] }
  0xe8   : > { %1060 = vmatprep.subr.bf16.mxu1 %v1257_v34  ;;  %1019 = vmatprep.mubr.msk.f32.mxu0 %vm524_vm3, %v346_v0 }
  0xe9   : > { %v452_v52 = vld [vmem:[#allocation3 + $0x38] sm:$0xff] }
  0xea   : > { %v451_v51 = vld [vmem:[#allocation3 + $0x30] sm:$0xff] }
  0xeb   : > { %1062 = vmatpush3.bf16.msra.mxu1 %v1061_v47  ;;  %v1067_v53 = vpack.c.bf16 %v452_v52, %v451_v51 }
  0xec   : > { %1063 = vmatprep.subr.bf16.mxu1 %v1257_v34 }
  0xef   : > { %1065 = vmatpush3.bf16.msra.mxu1 %v1064_v50 }
  0xf0   : > { %1066 = vmatprep.subr.bf16.mxu1 %v1257_v34  ;;  %v347_v34 = vld [vmem:[%s1528_s2 + $0x8] sm:$0xff] }
  0xf3   : > { %1068 = vmatpush3.bf16.msra.mxu1 %v1067_v53 }
  0xf6   : > { %1015 = vmatmul.mubr.msk.f32.vlgmr.msra.gmra.mrb[2].mxu1 %vm370_vm2, %v345_v43 }
 0x1b9   : > { %v440_v54 = vpop.f32.mrb[0].mxu1 }
 0x1ba   : > { %v997_v55 = vpop.f32.mrb[1].mxu1  ;;  %v444_v59 = vmax.f32 %v440_v54, 0.0 }
 0x1c9   : > { %v519_v56 = vpop.f32.mrb[2].mxu1 }
 0x1ca   : > { %v523_v57 = vmax.f32 %v519_v56, 0.0  ;;  %v1016_v58 = vpop.f32.mrb[3].mxu1 }
 0x1cc   : > { %1017 = vmatprep.subr.msk.mxu0 %vm549_vm4, %v523_v57 }
 0x1cd   : > { %1018 = vmatpush3.msk.msra.mxu0 %vm549_vm4, %v523_v57 }
 0x1ce   : > { %1020 = vmatmul.mubr.msk.f32.vlgmr.msra.gmra.mrb[0].mxu0 %vm524_vm3, %v347_v34  ;;  %1031 = vmatprep.subr.msk.mxu0 %vm549_vm4, %v444_v59 }
 0x1cf   : > { %1032 = vmatpush3.msk.msra.mxu0 %vm549_vm4, %v444_v59  ;;  %1022 = vmatprep.mubr.msk.f32.mxu0 %vm524_vm3, %v348_v60 }
 0x1d2   : > { %1023 = vmatmul.mubr.msk.f32.gmra.mrb[2].mxu0 %vm524_vm3, %v349_v61 }
 0x1d3   : > { %1025 = vmatprep.mubr.msk.f32.mxu0 %vm524_vm3, %v350_v62 }
 0x1d6   : > { %1026 = vmatmul.mubr.msk.f32.gmra.mrb[4].mxu0 %vm524_vm3, %v351_v63 }
 0x1d7   : > { %1028 = vmatprep.mubr.msk.f32.mxu0 %vm524_vm3, %v352_v1 }
 0x1da   : > { %1029 = vmatmul.mubr.msk.f32.gmra.mrb[6].mxu0 %vm524_vm3, %v353_v2 }
 0x1db   : > { %1033 = vmatprep.mubr.msk.f32.mxu0 %vm524_vm3, %v346_v0 }
 0x1de   : > { %1034 = vmatmul.mubr.msk.f32.vlgmr.msra.gmra.mrb[0].mxu0 %vm524_vm3, %v347_v34 }
 0x1df   : > { %1036 = vmatprep.mubr.msk.f32.mxu0 %vm524_vm3, %v348_v60 }
 0x1e2   : > { %1037 = vmatmul.mubr.msk.f32.gmra.mrb[2].mxu0 %vm524_vm3, %v349_v61 }
 0x1e3   : > { %1039 = vmatprep.mubr.msk.f32.mxu0 %vm524_vm3, %v350_v62 }
 0x1e6   : > { %1040 = vmatmul.mubr.msk.f32.gmra.mrb[4].mxu0 %vm524_vm3, %v351_v63 }
 0x1e7   : > { %1042 = vmatprep.mubr.msk.f32.mxu0 %vm524_vm3, %v352_v1 }
 0x1ea   : > { %1043 = vmatmul.mubr.msk.f32.gmra.mrb[6].mxu0 %vm524_vm3, %v353_v2 }
 0x2b1   : > { %v1035_v3 = vpop.f32.mrb[0].mxu0 }
 0x2b2   : > { %v932_v4 = vmul.f32 -1.442695, %v1035_v3  ;;  %v727_v5 = vpop.f32.mrb[1].mxu0 }
 0x2b3   : > { %v931_v6 = vmul.f32 -1.442695, %v727_v5 }
 0x2b4   : > { %1138 = vpow2.f32 %v932_v4 }
 0x2b5   : > { %1140 = vpow2.f32 %v931_v6  ;;  %v1038_v7 = vpop.f32.mrb[2].mxu0 }
 0x2b6   : > { %v934_v8 = vmul.f32 -1.442695, %v1038_v7  ;;  %v737_v9 = vpop.f32.mrb[3].mxu0 }
 0x2b7   : > { %v933_v10 = vmul.f32 -1.442695, %v737_v9 }
 0x2b8   : > { %1142 = vpow2.f32 %v934_v8 }
 0x2b9   : > { %1144 = vpow2.f32 %v933_v10  ;;  %v1041_v11 = vpop.f32.mrb[4].mxu0 }
 0x2ba   : > { %v936_v12 = vmul.f32 -1.442695, %v1041_v11  ;;  %v747_v13 = vpop.f32.mrb[5].mxu0 }
 0x2bb   : > { %v935_v14 = vmul.f32 -1.442695, %v747_v13 }
 0x2bc   : > { %1146 = vpow2.f32 %v936_v12 }
 0x2bd   : > { %1148 = vpow2.f32 %v935_v14  ;;  %v1044_v15 = vpop.f32.mrb[6].mxu0 }
 0x2be   : > { %v1139_v16 = vpop.eup %1138  ;;  %v938_v17 = vmul.f32 -1.442695, %v1044_v15  ;;  %v757_v18 = vpop.f32.mrb[7].mxu0 }
 0x2bf   : > { %v1141_v19 = vpop.eup %1140  ;;  %v791_v20 = vadd.f32 1.0, %v1139_v16  ;;  %v937_v21 = vmul.f32 -1.442695, %v757_v18 }
 0x2c0   : > { %v790_v22 = vadd.f32 1.0, %v1141_v19  ;;  %1150 = vpow2.f32 %v938_v17 }
 0x2c1   : > { %1152 = vrcp.f32 %v791_v20 }
 0x2c2   : > { %v1143_v23 = vpop.eup %1142  ;;  %1154 = vrcp.f32 %v790_v22 }
 0x2c3   : > { %v1145_v24 = vpop.eup %1144  ;;  %v793_v25 = vadd.f32 1.0, %v1143_v23  ;;  %1156 = vpow2.f32 %v937_v21 }
 0x2c4   : > { %v792_v26 = vadd.f32 1.0, %v1145_v24 }
 0x2c5   : > { %1158 = vrcp.f32 %v793_v25 }
 0x2c6   : > { %v1147_v27 = vpop.eup %1146  ;;  %1160 = vrcp.f32 %v792_v26 }
 0x2c7   : > { %v1149_v28 = vpop.eup %1148  ;;  %v795_v29 = vadd.f32 1.0, %v1147_v27 }
 0x2c8   : > { %v794_v30 = vadd.f32 1.0, %v1149_v28 }
 0x2c9   : > { %1162 = vrcp.f32 %v795_v29 }
 0x2ca   : > { %v1151_v31 = vpop.eup %1150  ;;  %1164 = vrcp.f32 %v794_v30 }
 0x2cb   : > { %v1153_v32 = vpop.eup %1152  ;;  %v797_v33 = vadd.f32 1.0, %v1151_v31 }
 0x2cc   : > { %v1155_v35 = vpop.eup %1154  ;;  %815 = vst.msk [vmem:[%s207_s30 + $0x8] sm:$0xff] %vm212_vm0, %v1153_v32 }
 0x2cd   : > { %v1157_v36 = vpop.eup %1156  ;;  %814 = vst.msk [vmem:[%s207_s30] sm:$0xff] %vm212_vm0, %v1155_v35  ;;  %1166 = vrcp.f32 %v797_v33 }
 0x2ce   : > { %v796_v37 = vadd.f32 1.0, %v1157_v36 }
 0x2cf   : > { %v1159_v38 = vpop.eup %1158 }
 0x2d0   : > { %v1161_v39 = vpop.eup %1160  ;;  %817 = vst.msk [vmem:[%s207_s30 + $0x18] sm:$0xff] %vm212_vm0, %v1159_v38  ;;  %1168 = vrcp.f32 %v796_v37 }
 0x2d1   : > { %816 = vst.msk [vmem:[%s207_s30 + $0x10] sm:$0xff] %vm212_vm0, %v1161_v39 }
 0x2d3   : > { %v1163_v40 = vpop.eup %1162 }
 0x2d4   : > { %v1165_v41 = vpop.eup %1164  ;;  %819 = vst.msk [vmem:[%s207_s30 + $0x28] sm:$0xff] %vm212_vm0, %v1163_v40 }
 0x2d5   : > { %818 = vst.msk [vmem:[%s207_s30 + $0x20] sm:$0xff] %vm212_vm0, %v1165_v41 }
 0x2d7   : > { %v1167_v42 = vpop.eup %1166 }
 0x2d8   : > { %821 = vst.msk [vmem:[%s207_s30 + $0x38] sm:$0xff] %vm212_vm0, %v1167_v42 }
 0x2da   : > { %v1169_v43 = vpop.eup %1168 }
 0x2db   : > { %820 = vst.msk [vmem:[%s207_s30 + $0x30] sm:$0xff] %vm212_vm0, %v1169_v43 }
 0x2dc PF: > { %s16_s17 = sadd.s32 1, %s1250_s17   ;;  %s1533_s12 = smov %s1234_s13 }
 0x2dd   : > { %p13_p9 = scmp.ge.s32.totalorder %s16_s17, 4   ;;  %s1534_s13 = smov %s1238_s14 }
 0x2de   : > { %s1535_s14 = smov %s1328_s24  ;;  %s1536_s15 = smov %s1246_s16 }
 0x2df   : > { %s1537_s16 = smov %s1539_s19  ;;  %15 = sbr.rel (!%p13_p9) target bundleno = 4 (0x4), region = 80 }
 0x2e6   :  { %843 = vsyncpa [#allocation5], 1 }
 0x2e7   :  { %845 = vsyncpa [#allocation5 + $0x1], 1 }

</bundles_post_ra>
